<compile_context>
chip_gen: v6e
topology: v6e:2x2x1
jax: 0.10.0
libtpu: 0.0.40
codegen_flags: <defaults>
</compile_context>

<pallas_src>
import jax
import jax.numpy as jnp
from jax.experimental import pallas as pl
from jax.experimental.pallas import tpu as pltpu


def _round_up(x, m):
    return ((x + m - 1) // m) * m


def action_encoder_kernel(xs_ref, w1_ref, b1_ref, w2_ref, b2_ref, w3_ref, b3_ref,
                          out_ref):
    # Elementwise sum of the three inputs for this row tile (kept f32 — v5e has
    # no bf16 VPU; the sum stays inside the kernel so the hot path is fused).
    x = xs_ref[0] + xs_ref[1] + xs_ref[2]                      # (TM, in_dim) f32

    cdt = w1_ref.dtype  # matmul operand dtype (f32 or bf16); accumulate in f32

    # Linear 1 -> ReLU
    h1 = jnp.dot(x.astype(cdt), w1_ref[...],
                 preferred_element_type=jnp.float32) + b1_ref[...]
    h1 = jnp.maximum(h1, 0.0)

    # Linear 2 -> ReLU
    h2 = jnp.dot(h1.astype(cdt), w2_ref[...],
                 preferred_element_type=jnp.float32) + b2_ref[...]
    h2 = jnp.maximum(h2, 0.0)

    # Linear 3 -> Softmax over the (lane-dense, padded-to-128) feature dim.
    # Padded columns carry a -1e30 bias so exp(...) underflows to 0 and the
    # normalizer matches the unpadded softmax exactly.
    logits = jnp.dot(h2.astype(cdt), w3_ref[...],
                     preferred_element_type=jnp.float32) + b3_ref[...]
    m = jnp.max(logits, axis=-1, keepdims=True)
    e = jnp.exp(logits - m)
    denom = jnp.sum(e, axis=-1, keepdims=True)
    out_ref[...] = e * pl.reciprocal(denom, approx=True)       # EUP vrcp slot


def action_encoder_forward(s0, ss, A, params, *, block_rows=512, use_bf16=False):
    """Fused skill_encoder forward. s0/ss/A: (B, in_dim) f32. Returns (B, E) f32."""
    w1, b1, w2, b2, w3, b3 = params
    B, in_dim = s0.shape
    E = w3.shape[1]

    # ---- lane-dense output: pad skill_embed dim up to a multiple of 128 ------
    E_pad = _round_up(E, 128)
    if E_pad != E:
        w3 = jnp.pad(w3, ((0, 0), (0, E_pad - E)))                      # zero cols
        b3 = jnp.pad(b3, ((0, 0), (0, E_pad - E)), constant_values=-1e30)

    # ---- batch tiling (TM multiple of 8; pad batch to a multiple of TM) ------
    TM = _round_up(min(block_rows, _round_up(B, 8)), 8)
    Bp = _round_up(B, TM)

    # ---- single stacked activation stream: one DMA instead of three ---------
    xs = jnp.stack([s0, ss, A], axis=0)                                 # (3, B, in_dim)
    if Bp != B:
        xs = jnp.pad(xs, ((0, 0), (0, Bp - B), (0, 0)))

    if use_bf16:
        # bf16 MXU path for v6e/v7x; biases / elementwise math stay f32.
        w1 = w1.astype(jnp.bfloat16)
        w2 = w2.astype(jnp.bfloat16)
        w3 = w3.astype(jnp.bfloat16)

    grid = (Bp // TM,)

    def pinned(shape):  # weights/biases: constant block index -> stay VMEM-resident
        return pl.BlockSpec(shape, lambda i: (0,) * len(shape))

    out = pl.pallas_call(
        action_encoder_kernel,
        out_shape=jax.ShapeDtypeStruct((Bp, E_pad), jnp.float32),
        grid=grid,
        in_specs=[
            pl.BlockSpec((3, TM, in_dim), lambda i: (0, i, 0)),   # activations, tiled over rows
            pinned(w1.shape), pinned(b1.shape),
            pinned(w2.shape), pinned(b2.shape),
            pinned(w3.shape), pinned(b3.shape),
        ],
        out_specs=pl.BlockSpec((TM, E_pad), lambda i: (i, 0)),
        compiler_params=pltpu.CompilerParams(
            dimension_semantics=("parallel",)),                  # megacore on v7x
    )(xs, w1, b1, w2, b2, w3, b3)

    return out[:B, :E]


def init_params(key, in_dim, hidden, skill_embed):
    ks = jax.random.split(key, 6)

    # Deterministic synthetic init (uniform fan-in scaling, like PyTorch defaults).
    def lin(kw, kb, fan_in, fan_out):
        bound = 1.0 / jnp.sqrt(jnp.float32(fan_in))
        w = jax.random.uniform(kw, (fan_in, fan_out), jnp.float32, -bound, bound)
        b = jax.random.uniform(kb, (1, fan_out), jnp.float32, -bound, bound)
        return w, b

    w1, b1 = lin(ks[0], ks[1], in_dim, hidden)
    w2, b2 = lin(ks[2], ks[3], hidden, hidden)
    w3, b3 = lin(ks[4], ks[5], hidden, skill_embed)
    return (w1, b1, w2, b2, w3, b3)


def reference_forward(s0, ss, A, params):
    w1, b1, w2, b2, w3, b3 = params
    x = s0 + ss + A
    h1 = jnp.maximum(x @ w1 + b1, 0.0)
    h2 = jnp.maximum(h1 @ w2 + b2, 0.0)
    logits = h2 @ w3 + b3
    return jax.nn.softmax(logits, axis=-1)


if __name__ == "__main__":
    # Small shapes consistent with the module:
    # horizon=4, action_num=2 -> actions_num=8; state_num=4; road_state_num=4
    # -> skill_encoder input dim = 8 + 4 + 4 = 16; hidden=128; skill_embed_size=9.
    horizon, action_num, state_num, road_state_num = 4, 2, 4, 4
    in_dim = horizon * action_num + road_state_num + state_num   # 16
    hidden = 128
    skill_embed = 9
    batch = 200   # not a multiple of the tile -> exercises batch padding + grid

    key = jax.random.PRNGKey(0)
    k_s0, k_ss, k_A, k_p = jax.random.split(key, 4)

    # forward() sums s_0 + s_s + A elementwise, so all three share shape (batch, in_dim).
    s0 = jax.random.normal(k_s0, (batch, in_dim), jnp.float32)
    ss = jax.random.normal(k_ss, (batch, in_dim), jnp.float32)
    A = jax.random.normal(k_A, (batch, in_dim), jnp.float32)

    params = init_params(k_p, in_dim, hidden, skill_embed)
    ref = reference_forward(s0, ss, A, params)

    # f32 matmul path, multi-step grid (block_rows=128 -> 2 grid steps over padded B=256).
    out_f32 = action_encoder_forward(s0, ss, A, params, block_rows=128, use_bf16=False)
    out_f32 = jax.block_until_ready(out_f32)
    assert out_f32.shape == (batch, skill_embed)
    # tolerance relaxed from 1e-5 for the approx (EUP) reciprocal in the softmax
    assert jnp.allclose(out_f32, ref, atol=1e-3, rtol=1e-3)

    # bf16 MXU path (v6e/v7x-oriented); f32 accumulation + f32 softmax stats.
    out_bf16 = action_encoder_forward(s0, ss, A, params, use_bf16=True)
    out_bf16 = jax.block_until_ready(out_bf16)
    assert out_bf16.shape == (batch, skill_embed)
    assert jnp.allclose(out_bf16, ref, atol=2e-2, rtol=2e-2)

    print("KERNEL_OK")
</pallas_src>

<mosaic_0001>
module attributes {stable_mosaic.version = 11 : i64} {
  func.func @action_encoder_kernel(%arg0: i32, %arg1: memref<3x128x16xf32, #tpu.memory_space<vmem>>, %arg2: memref<16x128xf32, #tpu.memory_space<vmem>>, %arg3: memref<1x128xf32, #tpu.memory_space<vmem>>, %arg4: memref<128x128xf32, #tpu.memory_space<vmem>>, %arg5: memref<1x128xf32, #tpu.memory_space<vmem>>, %arg6: memref<128x128xf32, #tpu.memory_space<vmem>>, %arg7: memref<1x128xf32, #tpu.memory_space<vmem>>, %arg8: memref<128x128xf32, #tpu.memory_space<vmem>>) attributes {dimension_semantics = [#tpu.dimension_semantics<parallel>], iteration_bounds = array<i64: 2>, scalar_prefetch = 0 : i64, scratch_operands = 0 : i64, tpu.core_type = #tpu.core_type<tc>, window_params = [{transform_indices = @transform_0, window_bounds = array<i64: 3, 128, 16>}, {pipeline_mode = #tpu.pipeline_mode<synchronous>, transform_indices = @transform_1, window_bounds = array<i64: 16, 128>}, {pipeline_mode = #tpu.pipeline_mode<synchronous>, transform_indices = @transform_2, window_bounds = array<i64: 1, 128>}, {pipeline_mode = #tpu.pipeline_mode<synchronous>, transform_indices = @transform_3, window_bounds = array<i64: 128, 128>}, {pipeline_mode = #tpu.pipeline_mode<synchronous>, transform_indices = @transform_4, window_bounds = array<i64: 1, 128>}, {pipeline_mode = #tpu.pipeline_mode<synchronous>, transform_indices = @transform_5, window_bounds = array<i64: 128, 128>}, {pipeline_mode = #tpu.pipeline_mode<synchronous>, transform_indices = @transform_6, window_bounds = array<i64: 1, 128>}, {transform_indices = @transform_7, window_bounds = array<i64: 128, 128>}]} {
    %c0 = arith.constant 0 : index
    %c0_0 = arith.constant 0 : index
    %c0_1 = arith.constant 0 : index
    %0 = vector.load %arg1[%c0, %c0_0, %c0_1] : memref<3x128x16xf32, #tpu.memory_space<vmem>>, vector<1x128x16xf32>
    %1 = vector.shape_cast %0 : vector<1x128x16xf32> to vector<128x16xf32>
    %c1 = arith.constant 1 : index
    %c0_2 = arith.constant 0 : index
    %c0_3 = arith.constant 0 : index
    %2 = vector.load %arg1[%c1, %c0_2, %c0_3] : memref<3x128x16xf32, #tpu.memory_space<vmem>>, vector<1x128x16xf32>
    %3 = vector.shape_cast %2 : vector<1x128x16xf32> to vector<128x16xf32>
    %4 = arith.addf %1, %3 : vector<128x16xf32>
    %c2 = arith.constant 2 : index
    %c0_4 = arith.constant 0 : index
    %c0_5 = arith.constant 0 : index
    %5 = vector.load %arg1[%c2, %c0_4, %c0_5] : memref<3x128x16xf32, #tpu.memory_space<vmem>>, vector<1x128x16xf32>
    %6 = vector.shape_cast %5 : vector<1x128x16xf32> to vector<128x16xf32>
    %7 = arith.addf %4, %6 : vector<128x16xf32>
    %c0_6 = arith.constant 0 : index
    %c0_7 = arith.constant 0 : index
    %8 = vector.load %arg2[%c0_6, %c0_7] : memref<16x128xf32, #tpu.memory_space<vmem>>, vector<16x128xf32>
    %cst = arith.constant dense<0.000000e+00> : vector<128x128xf32>
    %9 = tpu.matmul %7, %8, %cst {dimension_numbers = #tpu.dot_dimension_numbers<[1], [0], [0], [1], [0, 0, 1, 1], [], []>} : vector<128x16xf32>, vector<16x128xf32>, vector<128x128xf32> -> vector<128x128xf32>
    %c0_8 = arith.constant 0 : index
    %c0_9 = arith.constant 0 : index
    %10 = vector.load %arg3[%c0_8, %c0_9] : memref<1x128xf32, #tpu.memory_space<vmem>>, vector<1x128xf32>
    %11 = vector.broadcast %10 : vector<1x128xf32> to vector<128x128xf32>
    %12 = arith.addf %9, %11 : vector<128x128xf32>
    %cst_10 = arith.constant 0.000000e+00 : f32
    %13 = vector.broadcast %cst_10 : f32 to vector<128x128xf32>
    %14 = arith.maximumf %12, %13 : vector<128x128xf32>
    %c0_11 = arith.constant 0 : index
    %c0_12 = arith.constant 0 : index
    %15 = vector.load %arg4[%c0_11, %c0_12] : memref<128x128xf32, #tpu.memory_space<vmem>>, vector<128x128xf32>
    %cst_13 = arith.constant dense<0.000000e+00> : vector<128x128xf32>
    %16 = tpu.matmul %14, %15, %cst_13 {dimension_numbers = #tpu.dot_dimension_numbers<[1], [0], [0], [1], [0, 0, 1, 1], [], []>} : vector<128x128xf32>, vector<128x128xf32>, vector<128x128xf32> -> vector<128x128xf32>
    %c0_14 = arith.constant 0 : index
    %c0_15 = arith.constant 0 : index
    %17 = vector.load %arg5[%c0_14, %c0_15] : memref<1x128xf32, #tpu.memory_space<vmem>>, vector<1x128xf32>
    %18 = vector.broadcast %17 : vector<1x128xf32> to vector<128x128xf32>
    %19 = arith.addf %16, %18 : vector<128x128xf32>
    %cst_16 = arith.constant 0.000000e+00 : f32
    %20 = vector.broadcast %cst_16 : f32 to vector<128x128xf32>
    %21 = arith.maximumf %19, %20 : vector<128x128xf32>
    %c0_17 = arith.constant 0 : index
    %c0_18 = arith.constant 0 : index
    %22 = vector.load %arg6[%c0_17, %c0_18] : memref<128x128xf32, #tpu.memory_space<vmem>>, vector<128x128xf32>
    %cst_19 = arith.constant dense<0.000000e+00> : vector<128x128xf32>
    %23 = tpu.matmul %21, %22, %cst_19 {dimension_numbers = #tpu.dot_dimension_numbers<[1], [0], [0], [1], [0, 0, 1, 1], [], []>} : vector<128x128xf32>, vector<128x128xf32>, vector<128x128xf32> -> vector<128x128xf32>
    %c0_20 = arith.constant 0 : index
    %c0_21 = arith.constant 0 : index
    %24 = vector.load %arg7[%c0_20, %c0_21] : memref<1x128xf32, #tpu.memory_space<vmem>>, vector<1x128xf32>
    %25 = vector.broadcast %24 : vector<1x128xf32> to vector<128x128xf32>
    %26 = arith.addf %23, %25 : vector<128x128xf32>
    %cst_22 = arith.constant dense<0xFF800000> : vector<128xf32>
    %27 = vector.multi_reduction <maximumf>, %26, %cst_22 [1] : vector<128x128xf32> to vector<128xf32>
    %28 = vector.shape_cast %27 : vector<128xf32> to vector<128x1xf32>
    %29 = vector.broadcast %28 : vector<128x1xf32> to vector<128x128xf32>
    %30 = arith.subf %26, %29 : vector<128x128xf32>
    %31 = math.exp %30 : vector<128x128xf32>
    %cst_23 = arith.constant dense<0.000000e+00> : vector<128xf32>
    %32 = vector.multi_reduction <add>, %31, %cst_23 [1] : vector<128x128xf32> to vector<128xf32>
    %33 = vector.shape_cast %32 : vector<128xf32> to vector<128x1xf32>
    %34 = tpu.reciprocal %33 {approx = true} : vector<128x1xf32> -> vector<128x1xf32>
    %35 = vector.broadcast %34 : vector<128x1xf32> to vector<128x128xf32>
    %36 = arith.mulf %31, %35 : vector<128x128xf32>
    %c0_24 = arith.constant 0 : index
    %c0_25 = arith.constant 0 : index
    %37 = vector.load %arg8[%c0_24, %c0_25] : memref<128x128xf32, #tpu.memory_space<vmem>>, vector<128x128xf32>
    tpu.vector_store %arg8[%c0_24, %c0_25], %36 {strides = array<i32>} : memref<128x128xf32, #tpu.memory_space<vmem>>, vector<128x128xf32>,
    return
  }
  func.func @transform_0(%arg0: i32) -> (i32, i32, i32) {
    %c0_i32 = arith.constant 0 : i32
    %c0_i32_0 = arith.constant 0 : i32
    %c0_i32_1 = arith.constant 0 : i32
    return %c0_i32, %arg0, %c0_i32_0 : i32, i32, i32
  }
  func.func @transform_1(%arg0: i32) -> (i32, i32) {
    %c0_i32 = arith.constant 0 : i32
    %c0_i32_0 = arith.constant 0 : i32
    %c0_i32_1 = arith.constant 0 : i32
    return %c0_i32, %c0_i32_0 : i32, i32
  }
  func.func @transform_2(%arg0: i32) -> (i32, i32) {
    %c0_i32 = arith.constant 0 : i32
    %c0_i32_0 = arith.constant 0 : i32
    %c0_i32_1 = arith.constant 0 : i32
    return %c0_i32, %c0_i32_0 : i32, i32
  }
  func.func @transform_3(%arg0: i32) -> (i32, i32) {
    %c0_i32 = arith.constant 0 : i32
    %c0_i32_0 = arith.constant 0 : i32
    %c0_i32_1 = arith.constant 0 : i32
    return %c0_i32, %c0_i32_0 : i32, i32
  }
  func.func @transform_4(%arg0: i32) -> (i32, i32) {
    %c0_i32 = arith.constant 0 : i32
    %c0_i32_0 = arith.constant 0 : i32
    %c0_i32_1 = arith.constant 0 : i32
    return %c0_i32, %c0_i32_0 : i32, i32
  }
  func.func @transform_5(%arg0: i32) -> (i32, i32) {
    %c0_i32 = arith.constant 0 : i32
    %c0_i32_0 = arith.constant 0 : i32
    %c0_i32_1 = arith.constant 0 : i32
    return %c0_i32, %c0_i32_0 : i32, i32
  }
  func.func @transform_6(%arg0: i32) -> (i32, i32) {
    %c0_i32 = arith.constant 0 : i32
    %c0_i32_0 = arith.constant 0 : i32
    %c0_i32_1 = arith.constant 0 : i32
    return %c0_i32, %c0_i32_0 : i32, i32
  }
  func.func @transform_7(%arg0: i32) -> (i32, i32) {
    %c0_i32 = arith.constant 0 : i32
    %c0_i32_0 = arith.constant 0 : i32
    return %arg0, %c0_i32 : i32, i32
  }
}

</mosaic_0001>

<bundles_post_ra>
// kernel: tpu_custom_call.1
= control target key start
LH: loop header
LB: loop body
LE: loop exit
PB: predicated region body
PF: predicated region fallthrough
CT: control target
= control target key end

     0   :  { %12 = vsyncpa [#allocation4], 0  ;;  %s2392_s0 = inlined_call_operand.vmem [shape: f32[3,256,16], index: 0, kind: input, shape index: {}]   ;;  %s2393_s1 = inlined_call_operand.vmem [shape: f32[16,128], index: 1, kind: input, shape index: {}]   ;;  %s2394_s2 = inlined_call_operand.vmem [shape: f32[1,128], index: 2, kind: input, shape index: {}]   ;;  %s2395_s3 = inlined_call_operand.vmem [shape: f32[128,128], index: 3, kind: input, shape index: {}]   ;;  %s2396_s4 = inlined_call_operand.vmem [shape: f32[1,128], index: 4, kind: input, shape index: {}]   ;;  %s2397_s5 = inlined_call_operand.vmem [shape: f32[128,128], index: 5, kind: input, shape index: {}]   ;;  %s2398_s6 = inlined_call_operand.vmem [shape: f32[1,128], index: 6, kind: input, shape index: {}]   ;;  %s2399_s7 = inlined_call_operand.hbm [shape: f32[256,128], index: 7, kind: output, shape index: {}]  }
   0x1   :  { %14 = vsyncpa [#allocation4 + $0x1], 0  ;;  %s1897_s24 = smov 0   ;;  %s1899_s25 = smov 0  }
   0x2   :  { %s1901_s26 = smov 0   ;;  %s1903_s27 = smov 0  }
   0x3 LB: > { %s1397_s28 = sadd.s32 4294967295, %s1852_s27   ;;  %s1398_s29 = sadd.s32 4294967294, %s1852_s27   ;;  %s1852_s27 = sphi %s1903_s27, %s2405_s27   ;;  %s1848_s26 = sphi %s1901_s26, %s2404_s26   ;;  %s1844_s25 = sphi %s1899_s25, %s2403_s25   ;;  %s1840_s24 = sphi %s1897_s24, %s2402_s24  }
   0x4   : > { %s1920_s30 = sadd.s32 1, %s1852_s27   ;;  %s27_s8 = sadd.s32 1, %s1848_s26 }
   0x5   : > { %s24_s9 = ssub.s32 %s1852_s27, %s1920_s30  ;;  %p34_p0 = scmp.ne.s32.totalorder %s1848_s26, %s1844_s25 }
   0x6   : > { %p25_p1 = scmp.eq.s32.totalorder %s24_s9, 0  ;;  %p35_p2 = scmp.eq.s32.totalorder %s1852_s27, 0 }
   0x7   : > { %p190_p3 = scmp.eq.s32.totalorder %s1397_s28, 1  ;;  %p195_p4 = scmp.ne.s32.totalorder %s1844_s25, %s1840_s24 }
   0x8   : > { %s1933_s10 = scalar_select %p25_p1, %s1848_s26, %s27_s8  }
   0x9   : > { %p36_p5 = por %p35_p2, %p34_p0  ;;  %p1935_p6 = por %p190_p3, %p34_p0 }
   0xa   : > { %p196_p7 = scmp.eq.s32.totalorder %s1398_s29, 1  ;;  %p1400_p9 = scmp.ge.s32.totalorder %s1852_s27, 2 }
   0xc   : > { %p1939_p8 = por %p196_p7, %p195_p4  ;;  %230 = sbr.rel (%p1400_p9) target bundleno = 46 (0x2e), region = 40 }
  0x11   : > { %233 = sbr.rel (!%p36_p5) target bundleno = 46 (0x2e), region = 44  ;;  %s235_s13 = sand.u32 (%p36_p5), 1, %s1848_s26  }
  0x12   : > { %s1461_s14 = sshll.u32 (%p36_p5), %s1852_s27, 7  ;;  %s1685_s15 = smul.u32 (%p36_p5), 384, %s235_s13 }
  0x13   : > { %s1951_s18 = scalar_lea.vmem (%p36_p5), %s2392_s0, %s1461_s14 }
  0x14   : > { %v363_v0 = vld [vmem:[%s1951_s18] sm:$0xff] (%p36_p5)  ;;  %v365_v1 = vld [vmem:[%s1951_s18 + $0x8] sm:$0xff] (%p36_p5)  ;;  %v367_v2 = vld [vmem:[%s1951_s18 + $0x10] sm:$0xff] (%p36_p5)  ;;  %s1959_s19 = scalar_lea.vmem (%p36_p5), [#allocation2], %s1685_s15 }
  0x15   : > { %v369_v3 = vld [vmem:[%s1951_s18 + $0x18] sm:$0xff] (%p36_p5)  ;;  %v371_v4 = vld [vmem:[%s1951_s18 + $0x20] sm:$0xff] (%p36_p5)  ;;  %v373_v5 = vld [vmem:[%s1951_s18 + $0x28] sm:$0xff] (%p36_p5)  ;;  %364 = vst [vmem:[%s1959_s19] sm:$0xff] (%p36_p5), %v363_v0 }
  0x16   : > { %366 = vst [vmem:[%s1959_s19 + $0x8] sm:$0xff] %v365_v1  ;;  %368 = vst [vmem:[%s1959_s19 + $0x10] sm:$0xff] %v367_v2  ;;  %v375_v6 = vld [vmem:[%s1951_s18 + $0x30] sm:$0xff]  ;;  %v377_v7 = vld [vmem:[%s1951_s18 + $0x38] sm:$0xff] }
  0x17   : > { %370 = vst [vmem:[%s1959_s19 + $0x18] sm:$0xff] %v369_v3  ;;  %372 = vst [vmem:[%s1959_s19 + $0x20] sm:$0xff] %v371_v4  ;;  %v379_v8 = vld [vmem:[%s1951_s18 + $0x40] sm:$0xff]  ;;  %v381_v9 = vld [vmem:[%s1951_s18 + $0x48] sm:$0xff] }
  0x18   : > { %374 = vst [vmem:[%s1959_s19 + $0x28] sm:$0xff] %v373_v5  ;;  %376 = vst [vmem:[%s1959_s19 + $0x30] sm:$0xff] %v375_v6  ;;  %v383_v10 = vld [vmem:[%s1951_s18 + $0x50] sm:$0xff]  ;;  %v385_v11 = vld [vmem:[%s1951_s18 + $0x58] sm:$0xff] }
  0x19   : > { %378 = vst [vmem:[%s1959_s19 + $0x38] sm:$0xff] %v377_v7  ;;  %380 = vst [vmem:[%s1959_s19 + $0x40] sm:$0xff] %v379_v8  ;;  %v387_v12 = vld [vmem:[%s1951_s18 + $0x60] sm:$0xff]  ;;  %v389_v13 = vld [vmem:[%s1951_s18 + $0x68] sm:$0xff] }
  0x1a   : > { %382 = vst [vmem:[%s1959_s19 + $0x48] sm:$0xff] %v381_v9  ;;  %384 = vst [vmem:[%s1959_s19 + $0x50] sm:$0xff] %v383_v10  ;;  %v391_v14 = vld [vmem:[%s1951_s18 + $0x70] sm:$0xff]  ;;  %v393_v15 = vld [vmem:[%s1951_s18 + $0x78] sm:$0xff] }
  0x1b   : > { %386 = vst [vmem:[%s1959_s19 + $0x58] sm:$0xff] %v385_v11  ;;  %388 = vst [vmem:[%s1959_s19 + $0x60] sm:$0xff] %v387_v12  ;;  %v395_v16 = vld [vmem:[%s1951_s18 + $0x100] sm:$0xff]  ;;  %v397_v17 = vld [vmem:[%s1951_s18 + $0x108] sm:$0xff] }
  0x1c   : > { %390 = vst [vmem:[%s1959_s19 + $0x68] sm:$0xff] %v389_v13  ;;  %392 = vst [vmem:[%s1959_s19 + $0x70] sm:$0xff] %v391_v14  ;;  %v399_v18 = vld [vmem:[%s1951_s18 + $0x110] sm:$0xff]  ;;  %v401_v19 = vld [vmem:[%s1951_s18 + $0x118] sm:$0xff] }
  0x1d   : > { %394 = vst [vmem:[%s1959_s19 + $0x78] sm:$0xff] %v393_v15  ;;  %396 = vst [vmem:[%s1959_s19 + $0x80] sm:$0xff] %v395_v16  ;;  %v403_v20 = vld [vmem:[%s1951_s18 + $0x120] sm:$0xff]  ;;  %v405_v21 = vld [vmem:[%s1951_s18 + $0x128] sm:$0xff] }
  0x1e   : > { %398 = vst [vmem:[%s1959_s19 + $0x88] sm:$0xff] %v397_v17  ;;  %400 = vst [vmem:[%s1959_s19 + $0x90] sm:$0xff] %v399_v18  ;;  %v407_v22 = vld [vmem:[%s1951_s18 + $0x130] sm:$0xff]  ;;  %v409_v23 = vld [vmem:[%s1951_s18 + $0x138] sm:$0xff] }
  0x1f   : > { %402 = vst [vmem:[%s1959_s19 + $0x98] sm:$0xff] %v401_v19  ;;  %404 = vst [vmem:[%s1959_s19 + $0xa0] sm:$0xff] %v403_v20  ;;  %v411_v24 = vld [vmem:[%s1951_s18 + $0x140] sm:$0xff]  ;;  %v413_v25 = vld [vmem:[%s1951_s18 + $0x148] sm:$0xff] }
  0x20   : > { %406 = vst [vmem:[%s1959_s19 + $0xa8] sm:$0xff] %v405_v21  ;;  %408 = vst [vmem:[%s1959_s19 + $0xb0] sm:$0xff] %v407_v22  ;;  %v415_v26 = vld [vmem:[%s1951_s18 + $0x150] sm:$0xff]  ;;  %v417_v27 = vld [vmem:[%s1951_s18 + $0x158] sm:$0xff] }
  0x21   : > { %410 = vst [vmem:[%s1959_s19 + $0xb8] sm:$0xff] %v409_v23  ;;  %412 = vst [vmem:[%s1959_s19 + $0xc0] sm:$0xff] %v411_v24  ;;  %v419_v28 = vld [vmem:[%s1951_s18 + $0x160] sm:$0xff]  ;;  %v421_v29 = vld [vmem:[%s1951_s18 + $0x168] sm:$0xff] }
  0x22   : > { %414 = vst [vmem:[%s1959_s19 + $0xc8] sm:$0xff] %v413_v25  ;;  %416 = vst [vmem:[%s1959_s19 + $0xd0] sm:$0xff] %v415_v26  ;;  %v423_v30 = vld [vmem:[%s1951_s18 + $0x170] sm:$0xff]  ;;  %v425_v31 = vld [vmem:[%s1951_s18 + $0x178] sm:$0xff] }
  0x23   : > { %418 = vst [vmem:[%s1959_s19 + $0xd8] sm:$0xff] %v417_v27  ;;  %420 = vst [vmem:[%s1959_s19 + $0xe0] sm:$0xff] %v419_v28  ;;  %v427_v32 = vld [vmem:[%s1951_s18 + $0x200] sm:$0xff]  ;;  %v429_v33 = vld [vmem:[%s1951_s18 + $0x208] sm:$0xff] }
  0x24   : > { %422 = vst [vmem:[%s1959_s19 + $0xe8] sm:$0xff] %v421_v29  ;;  %424 = vst [vmem:[%s1959_s19 + $0xf0] sm:$0xff] %v423_v30  ;;  %v431_v34 = vld [vmem:[%s1951_s18 + $0x210] sm:$0xff]  ;;  %v433_v35 = vld [vmem:[%s1951_s18 + $0x218] sm:$0xff] }
  0x25   : > { %426 = vst [vmem:[%s1959_s19 + $0xf8] sm:$0xff] %v425_v31  ;;  %428 = vst [vmem:[%s1959_s19 + $0x100] sm:$0xff] %v427_v32  ;;  %v435_v36 = vld [vmem:[%s1951_s18 + $0x220] sm:$0xff]  ;;  %v437_v37 = vld [vmem:[%s1951_s18 + $0x228] sm:$0xff] }
  0x26   : > { %430 = vst [vmem:[%s1959_s19 + $0x108] sm:$0xff] %v429_v33  ;;  %432 = vst [vmem:[%s1959_s19 + $0x110] sm:$0xff] %v431_v34  ;;  %v439_v38 = vld [vmem:[%s1951_s18 + $0x230] sm:$0xff]  ;;  %v441_v39 = vld [vmem:[%s1951_s18 + $0x238] sm:$0xff] }
  0x27   : > { %434 = vst [vmem:[%s1959_s19 + $0x118] sm:$0xff] %v433_v35  ;;  %436 = vst [vmem:[%s1959_s19 + $0x120] sm:$0xff] %v435_v36  ;;  %v443_v40 = vld [vmem:[%s1951_s18 + $0x240] sm:$0xff]  ;;  %v445_v41 = vld [vmem:[%s1951_s18 + $0x248] sm:$0xff] }
  0x28   : > { %438 = vst [vmem:[%s1959_s19 + $0x128] sm:$0xff] %v437_v37  ;;  %440 = vst [vmem:[%s1959_s19 + $0x130] sm:$0xff] %v439_v38  ;;  %v447_v42 = vld [vmem:[%s1951_s18 + $0x250] sm:$0xff]  ;;  %v449_v43 = vld [vmem:[%s1951_s18 + $0x258] sm:$0xff] }
  0x29   : > { %442 = vst [vmem:[%s1959_s19 + $0x138] sm:$0xff] %v441_v39  ;;  %444 = vst [vmem:[%s1959_s19 + $0x140] sm:$0xff] %v443_v40  ;;  %v451_v44 = vld [vmem:[%s1951_s18 + $0x260] sm:$0xff]  ;;  %v453_v45 = vld [vmem:[%s1951_s18 + $0x268] sm:$0xff] }
  0x2a   : > { %446 = vst [vmem:[%s1959_s19 + $0x148] sm:$0xff] %v445_v41  ;;  %448 = vst [vmem:[%s1959_s19 + $0x150] sm:$0xff] %v447_v42  ;;  %v455_v46 = vld [vmem:[%s1951_s18 + $0x270] sm:$0xff]  ;;  %v457_v47 = vld [vmem:[%s1951_s18 + $0x278] sm:$0xff] }
  0x2b   : > { %450 = vst [vmem:[%s1959_s19 + $0x158] sm:$0xff] %v449_v43  ;;  %452 = vst [vmem:[%s1959_s19 + $0x160] sm:$0xff] %v451_v44 }
  0x2c   : > { %454 = vst [vmem:[%s1959_s19 + $0x168] sm:$0xff] %v453_v45  ;;  %456 = vst [vmem:[%s1959_s19 + $0x170] sm:$0xff] %v455_v46 }
  0x2d   : > { %458 = vst [vmem:[%s1959_s19 + $0x178] sm:$0xff] %v457_v47 }
  0x2e PF: > { %p1403_p10 = scmp.ge.s32.totalorder %s1852_s27, 1  ;;  %p463_p11 = scmp.lt.s32.totalorder %s1852_s27, 3 }
  0x30   : > { %p464_p12 = pnand %p1403_p10, %p463_p11 }
  0x31   : > { %s2060_s29 = sand.u32 (!%p464_p12), 1, %s1844_s25   ;;  %s1462_s21 = sshll.u32 (!%p464_p12), %s1397_s28, 11 }
  0x32   : > { %467 = sbr.rel (%p464_p12) target bundleno = 1016 (0x3f8), region = 82  ;;  %s1404_s18 = sshll.u32 (!%p464_p12), %s2060_s29, 7 }
  0x33   : > { %s1686_s13 = smul.u32 (!%p464_p12), 384, %s2060_s29  ;;  %s2308_s19 = scalar_lea.vmem (!%p464_p12), [#allocation3], %s1404_s18 }
  0x34   : > { %s1330_s22 = sshll.u32 (!%p464_p12), %s2308_s19, 4  ;;  %s2344_s9 = scalar_lea.hbm (!%p464_p12), %s2399_s7, %s1462_s21  ;;  %s2346_s22 = int_to_ptr.vmem [resolvable:$true] %s1330_s22 }
  0x35   : > { %s2075_s20 = scalar_lea.vmem (!%p464_p12), [#allocation2], %s1686_s13  ;;  %s1317_s28 = scalar_lea.sflag (!%p464_p12), [#allocation4], %s2060_s29 }
  0x36   : > { %s1792_s13 = scalar_lea.vmem (!%p464_p12), %s2346_s22, 2048  ;;  %s1854_s14 = smov (!%p464_p12), [#allocation3]  }
  0x37   : > { %v586_v48 = vld [vmem:[%s2393_s1 + $0x8] sm:$0xff]  ;;  %v585_v49 = vld [vmem:[%s2393_s1] sm:$0xff]  ;;  %v819_v50 = vld [vmem:[%s2395_s3 + $0x78] sm:$0xff]  ;;  %vm594_vm0 = vcmask 130048   ;;  %p1793_p13 = scmp.ne.s32.totalorder %s2346_s22, %s1792_s13  ;;  %s1796_s15 = sshll.u32 %s1854_s14, 4  ;;  %s1797_s15 = int_to_ptr.vmem [resolvable:$false] %s1796_s15 }
  0x38   : > { %1545 = vmatprep.subr.mxu0 %v586_v48  ;;  %1573 = vmatprep.subr.mxu1 %v819_v50  ;;  %v818_v51 = vld [vmem:[%s2395_s3 + $0x70] sm:$0xff]  ;;  %v817_v52 = vld [vmem:[%s2395_s3 + $0x68] sm:$0xff]  ;;  %v816_v53 = vld [vmem:[%s2395_s3 + $0x60] sm:$0xff]  ;;  %p1799_p2 = scmp.lt.s32.totalorder %s2346_s22, %s1797_s15 }
  0x39   : > { %1546 = vmatpush3.msra.mxu0 %v586_v48  ;;  %1574 = vmatpush3.msra.mxu1 %v819_v50  ;;  %v503_v54 = vld [vmem:[%s2075_s20] sm:$0xff]  ;;  %v815_v57 = vld [vmem:[%s2395_s3 + $0x58] sm:$0xff]  ;;  %v504_v59 = vld [vmem:[%s2075_s20 + $0x8] sm:$0xff]  ;;  %p1794_p0 = pnand %p1793_p13, %p1935_p6 }
  0x3a   : > { %1547 = vmatprep.subr.mxu0 %v585_v49  ;;  %1575 = vmatprep.subr.mxu1 %v818_v51  ;;  %v1405_v55 = vld [vmem:[%s2075_s20 + $0x80] sm:$0xff]  ;;  %v1406_v60 = vld [vmem:[%s2075_s20 + $0x88] sm:$0xff]  ;;  %v505_v63 = vld [vmem:[%s2075_s20 + $0x10] sm:$0xff] }
  0x3b   : > { %1548 = vmatpush3.msra.mxu0 %v585_v49  ;;  %v1421_v56 = vld [vmem:[%s2075_s20 + $0x100] sm:$0xff]  ;;  %1576 = vmatpush3.msra.mxu1 %v818_v51  ;;  %v536_v58 = vadd.f32 %v1405_v55, %v503_v54  ;;  %v1422_v61 = vld [vmem:[%s2075_s20 + $0x108] sm:$0xff]  ;;  %v537_v62 = vadd.f32 %v1406_v60, %v504_v59  ;;  %v1407_v0 = vld [vmem:[%s2075_s20 + $0x90] sm:$0xff]  ;;  %p1795_p1 = pneg %p1794_p0 }
  0x3c   : > { %1577 = vmatprep.subr.mxu1 %v817_v52  ;;  %v1423_v1 = vld [vmem:[%s2075_s20 + $0x110] sm:$0xff]  ;;  %v538_v4 = vadd.f32 %v1407_v0, %v505_v63  ;;  %v506_v5 = vld [vmem:[%s2075_s20 + $0x18] sm:$0xff]  ;;  %v507_v10 = vld [vmem:[%s2075_s20 + $0x20] sm:$0xff] }
  0x3d   : > { %1578 = vmatpush3.msra.mxu1 %v817_v52  ;;  %v814_v2 = vld [vmem:[%s2395_s3 + $0x50] sm:$0xff]  ;;  %v569_v3 = vadd.f32 %v1421_v56, %v536_v58  ;;  %v1408_v6 = vld [vmem:[%s2075_s20 + $0x98] sm:$0xff]  ;;  %v570_v8 = vadd.f32 %v1422_v61, %v537_v62  ;;  %v1409_v11 = vld [vmem:[%s2075_s20 + $0xa0] sm:$0xff] }
  0x3e   : > { %v1424_v7 = vld [vmem:[%s2075_s20 + $0x118] sm:$0xff]  ;;  %1579 = vmatprep.subr.mxu1 %v816_v53  ;;  %v539_v9 = vadd.f32 %v1408_v6, %v506_v5  ;;  %v1425_v12 = vld [vmem:[%s2075_s20 + $0x120] sm:$0xff]  ;;  %v571_v13 = vadd.f32 %v1423_v1, %v538_v4  ;;  %v540_v14 = vadd.f32 %v1409_v11, %v507_v10  ;;  %v508_v15 = vld [vmem:[%s2075_s20 + $0x28] sm:$0xff] }
  0x3f   : > { %1580 = vmatpush3.msra.mxu1 %v816_v53  ;;  %1549 = vmatprep.mubr.msk.f32.mxu0 %vm594_vm0, %v569_v3  ;;  %v1410_v16 = vld [vmem:[%s2075_s20 + $0xa8] sm:$0xff]  ;;  %v509_v20 = vld [vmem:[%s2075_s20 + $0x30] sm:$0xff]  ;;  %v812_v22 = vld [vmem:[%s2395_s3 + $0x40] sm:$0xff] }
  0x40   : > { %1581 = vmatprep.subr.mxu1 %v815_v57  ;;  %v813_v17 = vld [vmem:[%s2395_s3 + $0x48] sm:$0xff]  ;;  %1550 = vmatmul.mubr.msk.f32.vlgmr.msra.gmra.mxu0 %vm594_vm0, %v570_v8  ;;  %v572_v18 = vadd.f32 %v1424_v7, %v539_v9  ;;  %v541_v19 = vadd.f32 %v1410_v16, %v508_v15  ;;  %v1411_v21 = vld [vmem:[%s2075_s20 + $0xb0] sm:$0xff]  ;;  %v573_v23 = vadd.f32 %v1425_v12, %v540_v14  ;;  %v510_v26 = vld [vmem:[%s2075_s20 + $0x38] sm:$0xff] }
  0x41   : > { %1582 = vmatpush3.msra.mxu1 %v815_v57  ;;  %1552 = vmatprep.mubr.msk.f32.mxu0 %vm594_vm0, %v571_v13  ;;  %v1426_v24 = vld [vmem:[%s2075_s20 + $0x128] sm:$0xff]  ;;  %v542_v25 = vadd.f32 %v1411_v21, %v509_v20  ;;  %v1412_v27 = vld [vmem:[%s2075_s20 + $0xb8] sm:$0xff]  ;;  %v1427_v28 = vld [vmem:[%s2075_s20 + $0x130] sm:$0xff] }
  0x42   : > { %1583 = vmatprep.subr.mxu1 %v814_v2  ;;  %v511_v29 = vld [vmem:[%s2075_s20 + $0x40] sm:$0xff]  ;;  %v574_v31 = vadd.f32 %v1426_v24, %v541_v19  ;;  %v543_v32 = vadd.f32 %v1412_v27, %v510_v26  ;;  %v811_v33 = vld [vmem:[%s2395_s3 + $0x38] sm:$0xff]  ;;  %v810_v34 = vld [vmem:[%s2395_s3 + $0x30] sm:$0xff] }
  0x43   : > { %v1413_v30 = vld [vmem:[%s2075_s20 + $0xc0] sm:$0xff]  ;;  %1584 = vmatpush3.msra.mxu1 %v814_v2  ;;  %v575_v35 = vadd.f32 %v1427_v28, %v542_v25  ;;  %v1428_v36 = vld [vmem:[%s2075_s20 + $0x138] sm:$0xff]  ;;  %v512_v38 = vld [vmem:[%s2075_s20 + $0x48] sm:$0xff] }
  0x44   : > { %1585 = vmatprep.subr.mxu1 %v813_v17  ;;  %1553 = vmatmul.mubr.msk.f32.gmra.mxu0 %vm594_vm0, %v572_v18  ;;  %v544_v37 = vadd.f32 %v1413_v30, %v511_v29  ;;  %v1414_v39 = vld [vmem:[%s2075_s20 + $0xc8] sm:$0xff]  ;;  %v1429_v40 = vld [vmem:[%s2075_s20 + $0x140] sm:$0xff]  ;;  %v513_v41 = vld [vmem:[%s2075_s20 + $0x50] sm:$0xff]  ;;  %v576_v43 = vadd.f32 %v1428_v36, %v543_v32 }
  0x45   : > { %1586 = vmatpush3.msra.mxu1 %v813_v17  ;;  %1555 = vmatprep.mubr.msk.f32.mxu0 %vm594_vm0, %v573_v23  ;;  %v1415_v42 = vld [vmem:[%s2075_s20 + $0xd0] sm:$0xff]  ;;  %v545_v44 = vadd.f32 %v1414_v39, %v512_v38  ;;  %v1430_v45 = vld [vmem:[%s2075_s20 + $0x148] sm:$0xff]  ;;  %v514_v49 = vld [vmem:[%s2075_s20 + $0x58] sm:$0xff] }
  0x46   : > { %1587 = vmatprep.subr.mxu1 %v812_v22  ;;  %v1431_v46 = vld [vmem:[%s2075_s20 + $0x150] sm:$0xff]  ;;  %v577_v47 = vadd.f32 %v1429_v40, %v544_v37  ;;  %v546_v48 = vadd.f32 %v1415_v42, %v513_v41  ;;  %v1416_v50 = vld [vmem:[%s2075_s20 + $0xd8] sm:$0xff]  ;;  %v515_v51 = vld [vmem:[%s2075_s20 + $0x60] sm:$0xff] }
  0x47   : > { %1588 = vmatpush3.msra.mxu1 %v812_v22  ;;  %v1417_v52 = vld [vmem:[%s2075_s20 + $0xe0] sm:$0xff]  ;;  %v809_v53 = vld [vmem:[%s2395_s3 + $0x28] sm:$0xff]  ;;  %v578_v55 = vadd.f32 %v1430_v45, %v545_v44  ;;  %v547_v56 = vadd.f32 %v1416_v50, %v514_v49  ;;  %v1432_v58 = vld [vmem:[%s2075_s20 + $0x158] sm:$0xff] }
  0x48   : > { %1589 = vmatprep.subr.mxu1 %v811_v33  ;;  %1556 = vmatmul.mubr.msk.f32.gmra.mxu0 %vm594_vm0, %v574_v31  ;;  %v808_v54 = vld [vmem:[%s2395_s3 + $0x20] sm:$0xff]  ;;  %v579_v57 = vadd.f32 %v1431_v46, %v546_v48  ;;  %v548_v59 = vadd.f32 %v1417_v52, %v515_v51  ;;  %v516_v60 = vld [vmem:[%s2075_s20 + $0x68] sm:$0xff]  ;;  %v517_v63 = vld [vmem:[%s2075_s20 + $0x70] sm:$0xff] }
  0x49   : > { %1590 = vmatpush3.msra.mxu1 %v811_v33  ;;  %1558 = vmatprep.mubr.msk.f32.mxu0 %vm594_vm0, %v575_v35  ;;  %v1418_v61 = vld [vmem:[%s2075_s20 + $0xe8] sm:$0xff]  ;;  %v1433_v62 = vld [vmem:[%s2075_s20 + $0x160] sm:$0xff]  ;;  %v1419_v0 = vld [vmem:[%s2075_s20 + $0xf0] sm:$0xff]  ;;  %v580_v1 = vadd.f32 %v1432_v58, %v547_v56 }
  0x4a   : > { %1591 = vmatprep.subr.mxu1 %v810_v34  ;;  %v549_v2 = vadd.f32 %v1418_v61, %v516_v60  ;;  %v581_v3 = vadd.f32 %v1433_v62, %v548_v59  ;;  %v1434_v4 = vld [vmem:[%s2075_s20 + $0x168] sm:$0xff]  ;;  %v550_v5 = vadd.f32 %v1419_v0, %v517_v63  ;;  %v518_v6 = vld [vmem:[%s2075_s20 + $0x78] sm:$0xff]  ;;  %v1435_v8 = vld [vmem:[%s2075_s20 + $0x170] sm:$0xff] }
  0x4b   : > { %1592 = vmatpush3.msra.mxu1 %v810_v34  ;;  %v1420_v7 = vld [vmem:[%s2075_s20 + $0xf8] sm:$0xff]  ;;  %v806_v15 = vld [vmem:[%s2395_s3 + $0x10] sm:$0xff]  ;;  %v805_v16 = vld [vmem:[%s2395_s3 + $0x8] sm:$0xff] }
  0x4c   : > { %1593 = vmatprep.subr.mxu1 %v809_v53  ;;  %1559 = vmatmul.mubr.msk.f32.gmra.mxu0 %vm594_vm0, %v576_v43  ;;  %v582_v9 = vadd.f32 %v1434_v4, %v549_v2  ;;  %v551_v10 = vadd.f32 %v1420_v7, %v518_v6  ;;  %v583_v11 = vadd.f32 %v1435_v8, %v550_v5  ;;  %v1436_v12 = vld [vmem:[%s2075_s20 + $0x178] sm:$0xff]  ;;  %v804_v17 = vld [vmem:[%s2395_s3] sm:$0xff]  ;;  %v1002_v19 = vld [vmem:[%s2397_s5 + $0x70] sm:$0xff]  ;;  %s1798_s20 = scalar_lea.vmem %s1797_s15, 4096 }
  0x4d   : > { %1594 = vmatpush3.msra.mxu1 %v809_v53  ;;  %1561 = vmatprep.mubr.msk.f32.mxu0 %vm594_vm0, %v577_v47  ;;  %v807_v14 = vld [vmem:[%s2395_s3 + $0x18] sm:$0xff]  ;;  %v1001_v20 = vld [vmem:[%s2397_s5 + $0x68] sm:$0xff]  ;;  %v1000_v21 = vld [vmem:[%s2397_s5 + $0x60] sm:$0xff]  ;;  %p1800_p3 = scmp.lt.s32.totalorder %s1798_s20, %s1792_s13 }
  0x4e   : > { %1595 = vmatprep.subr.mxu1 %v808_v54  ;;  %v584_v13 = vadd.f32 %v1436_v12, %v551_v10  ;;  %v1003_v18 = vld [vmem:[%s2397_s5 + $0x78] sm:$0xff]  ;;  %v998_v23 = vld [vmem:[%s2397_s5 + $0x50] sm:$0xff]  ;;  %v997_v24 = vld [vmem:[%s2397_s5 + $0x48] sm:$0xff] }
  0x4f   : > { %1596 = vmatpush3.msra.mxu1 %v808_v54  ;;  %1629 = vmatprep.subr.mxu0 %v1003_v18  ;;  %v999_v22 = vld [vmem:[%s2397_s5 + $0x58] sm:$0xff]  ;;  %v996_v25 = vld [vmem:[%s2397_s5 + $0x40] sm:$0xff]  ;;  %v994_v27 = vld [vmem:[%s2397_s5 + $0x30] sm:$0xff]  ;;  %p1801_p4 = por %p1800_p3, %p1799_p2 }
  0x50   : > { %1562 = vmatmul.mubr.msk.f32.gmra.mxu0 %vm594_vm0, %v578_v55  ;;  %1597 = vmatprep.subr.mxu1 %v807_v14  ;;  %v995_v26 = vld [vmem:[%s2397_s5 + $0x38] sm:$0xff]  ;;  %v993_v28 = vld [vmem:[%s2397_s5 + $0x28] sm:$0xff]  ;;  %v992_v29 = vld [vmem:[%s2397_s5 + $0x20] sm:$0xff] }
  0x51   : > { %1564 = vmatprep.mubr.msk.f32.mxu0 %vm594_vm0, %v579_v57  ;;  %1598 = vmatpush3.msra.mxu1 %v807_v14  ;;  %v991_v30 = vld [vmem:[%s2397_s5 + $0x18] sm:$0xff]  ;;  %v1437_v31 = vld [vmem:[%s2394_s2] ss:$0 sm:$0xff]  ;;  %p1802_p5 = pnand %p1801_p4, %p1795_p1 }
  0x52   : > { %1599 = vmatprep.subr.mxu1 %v806_v15  ;;  %1630 = vmatpush3.msra.mxu0 %v1003_v18  ;;  %v988_v18 = vld [vmem:[%s2397_s5] sm:$0xff] }
  0x53   : > { %1600 = vmatpush3.msra.mxu1 %v806_v15  ;;  %1631 = vmatprep.subr.mxu0 %v1002_v19 }
  0x54   : > { %1565 = vmatmul.mubr.msk.f32.gmra.mxu0 %vm594_vm0, %v580_v1  ;;  %1601 = vmatprep.subr.mxu1 %v805_v16 }
  0x55   : > { %1567 = vmatprep.mubr.msk.f32.mxu0 %vm594_vm0, %v581_v3  ;;  %1602 = vmatpush3.msra.mxu1 %v805_v16  ;;  %v990_v16 = vld [vmem:[%s2397_s5 + $0x10] sm:$0xff] }
  0x56   : > { %1603 = vmatprep.subr.mxu1 %v804_v17  ;;  %1632 = vmatpush3.msra.mxu0 %v1002_v19  ;;  %v1454_v19 = vld [vmem:[%s2396_s4] ss:$0 sm:$0xff] }
  0x57   : > { %1604 = vmatpush3.msra.mxu1 %v804_v17  ;;  %1633 = vmatprep.subr.mxu0 %v1001_v20  ;;  %v989_v17 = vld [vmem:[%s2397_s5 + $0x8] sm:$0xff] }
  0x58   : > { %1568 = vmatmul.mubr.msk.f32.gmra.mxu0 %vm594_vm0, %v582_v9 }
  0x59   : > { %1570 = vmatprep.mubr.msk.f32.mxu0 %vm594_vm0, %v583_v11  ;;  %1634 = vmatpush3.msra.mxu0 %v1001_v20 }
  0x5a   : > { %1635 = vmatprep.subr.mxu0 %v1000_v21 }
  0x5b   : > { %1636 = vmatpush3.msra.mxu0 %v1000_v21 }
  0x5c   : > { %1571 = vmatmul.mubr.msk.f32.gmra.mxu0 %vm594_vm0, %v584_v13  ;;  %1637 = vmatprep.subr.mxu0 %v999_v22 }
  0x5d   : > { %1638 = vmatpush3.msra.mxu0 %v999_v22 }
  0x5e   : > { %1639 = vmatprep.subr.mxu0 %v998_v23 }
  0x5f   : > { %1640 = vmatpush3.msra.mxu0 %v998_v23 }
  0x60   : > { %1641 = vmatprep.subr.mxu0 %v997_v24 }
  0x61   : > { %1642 = vmatpush3.msra.mxu0 %v997_v24 }
  0x62   : > { %1643 = vmatprep.subr.mxu0 %v996_v25 }
  0x63   : > { %1644 = vmatpush3.msra.mxu0 %v996_v25 }
  0x64   : > { %1645 = vmatprep.subr.mxu0 %v995_v26 }
  0x65   : > { %1646 = vmatpush3.msra.mxu0 %v995_v26 }
  0x66   : > { %1647 = vmatprep.subr.mxu0 %v994_v27 }
  0x67   : > { %1648 = vmatpush3.msra.mxu0 %v994_v27 }
  0x68   : > { %1649 = vmatprep.subr.mxu0 %v993_v28 }
  0x69   : > { %1650 = vmatpush3.msra.mxu0 %v993_v28 }
  0x6a   : > { %1651 = vmatprep.subr.mxu0 %v992_v29 }
  0x6b   : > { %1652 = vmatpush3.msra.mxu0 %v992_v29 }
  0x6c   : > { %1653 = vmatprep.subr.mxu0 %v991_v30 }
  0x6d   : > { %1654 = vmatpush3.msra.mxu0 %v991_v30 }
  0x6e   : > { %1655 = vmatprep.subr.mxu0 %v990_v16 }
  0x6f   : > { %1656 = vmatpush3.msra.mxu0 %v990_v16 }
  0x70   : > { %1657 = vmatprep.subr.mxu0 %v989_v17 }
  0x71   : > { %1658 = vmatpush3.msra.mxu0 %v989_v17 }
  0x72   : > { %1659 = vmatprep.subr.mxu0 %v988_v18 }
  0x73   : > { %1660 = vmatpush3.msra.mxu0 %v988_v18 }
 0x100   : > { %v1551_v32 = vpop.f32.mrf.mxu0 }
 0x101   : > { %v715_v33 = vadd.f32 %v1551_v32, %v1437_v31 }
 0x102   : > { %v709_v34 = vpop.f32.mrf.mxu0 }
 0x103   : > { %v710_v35 = vadd.f32 %v1437_v31, %v709_v34  ;;  %v789_v38 = vmax.f32 %v715_v33, 0.0 }
 0x104   : > { %v1554_v36 = vpop.f32.mrf.mxu0 }
 0x105   : > { %v788_v37 = vmax.f32 %v710_v35, 0.0  ;;  %v725_v39 = vadd.f32 %v1554_v36, %v1437_v31 }
 0x106   : > { %v719_v40 = vpop.f32.mrf.mxu0 }
 0x107   : > { %v720_v41 = vadd.f32 %v1437_v31, %v719_v40  ;;  %1605 = vmatprep.mubr.f32.mxu1 %v788_v37  ;;  %v791_v45 = vmax.f32 %v725_v39, 0.0 }
 0x108   : > { %v1557_v42 = vpop.f32.mrf.mxu0  ;;  %1606 = vmatmul.mubr.f32.vlgmr.msra.gmra.mxu1 %v789_v38 }
 0x109   : > { %v790_v43 = vmax.f32 %v720_v41, 0.0  ;;  %v735_v44 = vadd.f32 %v1557_v42, %v1437_v31 }
 0x10a   : > { %v729_v46 = vpop.f32.mrf.mxu0 }
 0x10b   : > { %v730_v47 = vadd.f32 %v1437_v31, %v729_v46  ;;  %1608 = vmatprep.mubr.f32.mxu1 %v790_v43  ;;  %v793_v48 = vmax.f32 %v735_v44, 0.0 }
 0x10c   : > { %v1560_v49 = vpop.f32.mrf.mxu0  ;;  %1609 = vmatmul.mubr.f32.gmra.mxu1 %v791_v45 }
 0x10d   : > { %v792_v50 = vmax.f32 %v730_v47, 0.0  ;;  %v745_v51 = vadd.f32 %v1560_v49, %v1437_v31 }
 0x10e   : > { %v739_v52 = vpop.f32.mrf.mxu0 }
 0x10f   : > { %v740_v53 = vadd.f32 %v1437_v31, %v739_v52  ;;  %1611 = vmatprep.mubr.f32.mxu1 %v792_v50  ;;  %v795_v54 = vmax.f32 %v745_v51, 0.0 }
 0x110   : > { %v1563_v55 = vpop.f32.mrf.mxu0  ;;  %1612 = vmatmul.mubr.f32.gmra.mxu1 %v793_v48 }
 0x111   : > { %v794_v56 = vmax.f32 %v740_v53, 0.0  ;;  %v755_v57 = vadd.f32 %v1563_v55, %v1437_v31 }
 0x112   : > { %v749_v58 = vpop.f32.mrf.mxu0 }
 0x113   : > { %v750_v59 = vadd.f32 %v1437_v31, %v749_v58  ;;  %1614 = vmatprep.mubr.f32.mxu1 %v794_v56  ;;  %v797_v60 = vmax.f32 %v755_v57, 0.0 }
 0x114   : > { %v1566_v61 = vpop.f32.mrf.mxu0  ;;  %1615 = vmatmul.mubr.f32.gmra.mxu1 %v795_v54 }
 0x115   : > { %v796_v62 = vmax.f32 %v750_v59, 0.0  ;;  %v765_v63 = vadd.f32 %v1566_v61, %v1437_v31 }
 0x116   : > { %v759_v0 = vpop.f32.mrf.mxu0 }
 0x117   : > { %v760_v1 = vadd.f32 %v1437_v31, %v759_v0  ;;  %1617 = vmatprep.mubr.f32.mxu1 %v796_v62  ;;  %v799_v2 = vmax.f32 %v765_v63, 0.0 }
 0x118   : > { %v1569_v3 = vpop.f32.mrf.mxu0  ;;  %1618 = vmatmul.mubr.f32.gmra.mxu1 %v797_v60 }
 0x119   : > { %v798_v4 = vmax.f32 %v760_v1, 0.0  ;;  %v775_v5 = vadd.f32 %v1569_v3, %v1437_v31 }
 0x11a   : > { %v769_v6 = vpop.f32.mrf.mxu0 }
 0x11b   : > { %v770_v7 = vadd.f32 %v1437_v31, %v769_v6  ;;  %1620 = vmatprep.mubr.f32.mxu1 %v798_v4  ;;  %v801_v8 = vmax.f32 %v775_v5, 0.0  ;;  %v1455_v4 = vld [vmem:[%s2398_s6] ss:$0 sm:$0xff] }
 0x11c   : > { %v1572_v9 = vpop.f32.mrf.mxu0  ;;  %1621 = vmatmul.mubr.f32.gmra.mxu1 %v799_v2 }
 0x11d   : > { %v800_v10 = vmax.f32 %v770_v7, 0.0  ;;  %v785_v11 = vadd.f32 %v1572_v9, %v1437_v31 }
 0x11e   : > { %v779_v12 = vpop.f32.mrf.mxu0 }
 0x11f   : > { %v780_v13 = vadd.f32 %v1437_v31, %v779_v12  ;;  %1623 = vmatprep.mubr.f32.mxu1 %v800_v10  ;;  %v803_v14 = vmax.f32 %v785_v11, 0.0 }
 0x120   : > { %1624 = vmatmul.mubr.f32.gmra.mxu1 %v801_v8 }
 0x121   : > { %v802_v15 = vmax.f32 %v780_v13, 0.0 }
 0x123   : > { %1626 = vmatprep.mubr.f32.mxu1 %v802_v15 }
 0x124   : > { %1627 = vmatmul.mubr.f32.gmra.mxu1 %v803_v14 }
 0x1c8   : > { %v1607_v20 = vpop.f32.mrf.mxu1 }
 0x1c9   : > { %v899_v21 = vadd.f32 %v1607_v20, %v1454_v19 }
 0x1ca   : > { %v893_v22 = vpop.f32.mrf.mxu1 }
 0x1cb   : > { %v894_v23 = vadd.f32 %v1454_v19, %v893_v22  ;;  %v973_v26 = vmax.f32 %v899_v21, 0.0 }
 0x1cc   : > { %v1610_v24 = vpop.f32.mrf.mxu1 }
 0x1cd   : > { %v972_v25 = vmax.f32 %v894_v23, 0.0  ;;  %v909_v27 = vadd.f32 %v1610_v24, %v1454_v19 }
 0x1ce   : > { %v903_v28 = vpop.f32.mrf.mxu1 }
 0x1cf   : > { %v904_v29 = vadd.f32 %v1454_v19, %v903_v28  ;;  %1661 = vmatprep.mubr.f32.mxu0 %v972_v25  ;;  %v975_v32 = vmax.f32 %v909_v27, 0.0 }
 0x1d0   : > { %v1613_v30 = vpop.f32.mrf.mxu1  ;;  %1662 = vmatmul.mubr.f32.vlgmr.msra.gmra.mxu0 %v973_v26 }
 0x1d1   : > { %v974_v31 = vmax.f32 %v904_v29, 0.0  ;;  %v919_v33 = vadd.f32 %v1613_v30, %v1454_v19 }
 0x1d2   : > { %v913_v34 = vpop.f32.mrf.mxu1 }
 0x1d3   : > { %v914_v35 = vadd.f32 %v1454_v19, %v913_v34  ;;  %1664 = vmatprep.mubr.f32.mxu0 %v974_v31  ;;  %v977_v38 = vmax.f32 %v919_v33, 0.0 }
 0x1d4   : > { %v1616_v36 = vpop.f32.mrf.mxu1  ;;  %1665 = vmatmul.mubr.f32.gmra.mxu0 %v975_v32 }
 0x1d5   : > { %v976_v37 = vmax.f32 %v914_v35, 0.0  ;;  %v929_v39 = vadd.f32 %v1616_v36, %v1454_v19 }
 0x1d6   : > { %v923_v40 = vpop.f32.mrf.mxu1 }
 0x1d7   : > { %v924_v41 = vadd.f32 %v1454_v19, %v923_v40  ;;  %1667 = vmatprep.mubr.f32.mxu0 %v976_v37  ;;  %v979_v44 = vmax.f32 %v929_v39, 0.0 }
 0x1d8   : > { %v1619_v42 = vpop.f32.mrf.mxu1  ;;  %1668 = vmatmul.mubr.f32.gmra.mxu0 %v977_v38 }
 0x1d9   : > { %v978_v43 = vmax.f32 %v924_v41, 0.0  ;;  %v939_v45 = vadd.f32 %v1619_v42, %v1454_v19 }
 0x1da   : > { %v933_v46 = vpop.f32.mrf.mxu1 }
 0x1db   : > { %v934_v47 = vadd.f32 %v1454_v19, %v933_v46  ;;  %1670 = vmatprep.mubr.f32.mxu0 %v978_v43  ;;  %v981_v50 = vmax.f32 %v939_v45, 0.0 }
 0x1dc   : > { %v1622_v48 = vpop.f32.mrf.mxu1  ;;  %1671 = vmatmul.mubr.f32.gmra.mxu0 %v979_v44 }
 0x1dd   : > { %v980_v49 = vmax.f32 %v934_v47, 0.0  ;;  %v949_v51 = vadd.f32 %v1622_v48, %v1454_v19 }
 0x1de   : > { %v943_v52 = vpop.f32.mrf.mxu1 }
 0x1df   : > { %v944_v53 = vadd.f32 %v1454_v19, %v943_v52  ;;  %1673 = vmatprep.mubr.f32.mxu0 %v980_v49  ;;  %v983_v56 = vmax.f32 %v949_v51, 0.0 }
 0x1e0   : > { %v1625_v54 = vpop.f32.mrf.mxu1  ;;  %1674 = vmatmul.mubr.f32.gmra.mxu0 %v981_v50 }
 0x1e1   : > { %v982_v55 = vmax.f32 %v944_v53, 0.0  ;;  %v959_v57 = vadd.f32 %v1625_v54, %v1454_v19 }
 0x1e2   : > { %v953_v58 = vpop.f32.mrf.mxu1 }
 0x1e3   : > { %v954_v59 = vadd.f32 %v1454_v19, %v953_v58  ;;  %1676 = vmatprep.mubr.f32.mxu0 %v982_v55  ;;  %v985_v62 = vmax.f32 %v959_v57, 0.0 }
 0x1e4   : > { %v1628_v60 = vpop.f32.mrf.mxu1  ;;  %1677 = vmatmul.mubr.f32.gmra.mxu0 %v983_v56 }
 0x1e5   : > { %v984_v61 = vmax.f32 %v954_v59, 0.0  ;;  %v969_v63 = vadd.f32 %v1628_v60, %v1454_v19 }
 0x1e6   : > { %v963_v0 = vpop.f32.mrf.mxu1 }
 0x1e7   : > { %v964_v1 = vadd.f32 %v1454_v19, %v963_v0  ;;  %1679 = vmatprep.mubr.f32.mxu0 %v984_v61  ;;  %v987_v3 = vmax.f32 %v969_v63, 0.0 }
 0x1e8   : > { %1680 = vmatmul.mubr.f32.gmra.mxu0 %v985_v62 }
 0x1e9   : > { %v986_v2 = vmax.f32 %v964_v1, 0.0 }
 0x1eb   : > { %1682 = vmatprep.mubr.f32.mxu0 %v986_v2 }
 0x1ec   : > { %1683 = vmatmul.mubr.f32.gmra.mxu0 %v987_v3 }
 0x290   : > { %v1663_v5 = vpop.f32.mrf.mxu0 }
 0x291   : > { %v1083_v6 = vadd.f32 %v1663_v5, %v1455_v4 }
 0x292   : > { %v1077_v7 = vpop.f32.mrf.mxu0 }
 0x293   : > { %1158 = vmax.xlane.f32.xlu0 %v1083_v6  ;;  %v1078_v9 = vadd.f32 %v1455_v4, %v1077_v7 }
 0x294   : > { %v1666_v8 = vpop.f32.mrf.mxu0 }
 0x295   : > { %v1093_v10 = vadd.f32 %v1666_v8, %v1455_v4 }
 0x296   : > { %v1087_v11 = vpop.f32.mrf.mxu0 }
 0x297   : > { %1162 = vmax.xlane.f32.xlu1 %v1093_v10  ;;  %1156 = vmax.xlane.f32.xlu0 %v1078_v9  ;;  %v1088_v13 = vadd.f32 %v1455_v4, %v1087_v11 }
 0x298   : > { %v1669_v12 = vpop.f32.mrf.mxu0 }
 0x299   : > { %v1103_v17 = vadd.f32 %v1669_v12, %v1455_v4 }
 0x29a   : > { %v1097_v14 = vpop.f32.mrf.mxu0 }
 0x29b   : > { %v1098_v15 = vadd.f32 %v1455_v4, %v1097_v14  ;;  %1160 = vmax.xlane.f32.xlu1 %v1088_v13 }
 0x29c   : > { %v1672_v16 = vpop.f32.mrf.mxu0 }
 0x29d   : > { %1164 = vmax.xlane.f32.xlu0 %v1098_v15  ;;  %v1113_v21 = vadd.f32 %v1672_v16, %v1455_v4 }
 0x29e   : > { %v1107_v18 = vpop.f32.mrf.mxu0 }
 0x29f   : > { %v1108_v19 = vadd.f32 %v1455_v4, %v1107_v18  ;;  %1166 = vmax.xlane.f32.xlu1 %v1103_v17 }
 0x2a0   : > { %v1675_v20 = vpop.f32.mrf.mxu0 }
 0x2a1   : > { %1168 = vmax.xlane.f32.xlu0 %v1108_v19  ;;  %v1123_v25 = vadd.f32 %v1675_v20, %v1455_v4 }
 0x2a2   : > { %v1117_v22 = vpop.f32.mrf.mxu0 }
 0x2a3   : > { %v1118_v23 = vadd.f32 %v1455_v4, %v1117_v22  ;;  %1170 = vmax.xlane.f32.xlu1 %v1113_v21 }
 0x2a4   : > { %v1678_v24 = vpop.f32.mrf.mxu0 }
 0x2a5   : > { %1172 = vmax.xlane.f32.xlu0 %v1118_v23  ;;  %v2236_v29 = vadd.f32 %v1678_v24, %v1455_v4 }
 0x2a6   : > { %v1127_v26 = vpop.f32.mrf.mxu0 }
 0x2a7   : > { %v2234_v27 = vadd.f32 %v1455_v4, %v1127_v26  ;;  %1174 = vmax.xlane.f32.xlu1 %v1123_v25 }
 0x2a8   : > { %v1681_v28 = vpop.f32.mrf.mxu0 }
 0x2a9   : > { %1176 = vmax.xlane.f32.xlu0 %v2234_v27  ;;  %v2242_v33 = vadd.f32 %v1681_v28, %v1455_v4 }
 0x2aa   : > { %v1137_v30 = vpop.f32.mrf.mxu0 }
 0x2ab   : > { %v2239_v31 = vadd.f32 %v1455_v4, %v1137_v30  ;;  %1178 = vmax.xlane.f32.xlu1 %v2236_v29 }
 0x2ac   : > { %v1684_v32 = vpop.f32.mrf.mxu0 }
 0x2ad   : > { %1180 = vmax.xlane.f32.xlu0 %v2239_v31  ;;  %v2248_v36 = vadd.f32 %v1684_v32, %v1455_v4 }
 0x2ae   : > { %v1147_v34 = vpop.f32.mrf.mxu0 }
 0x2af   : > { %v2245_v35 = vadd.f32 %v1455_v4, %v1147_v34  ;;  %1182 = vmax.xlane.f32.xlu1 %v2242_v33 }
 0x2b1   : > { %1184 = vmax.xlane.f32.xlu0 %v2245_v35 }
 0x2b3   : > { %1186 = vmax.xlane.f32.xlu1 %v2248_v36 }
 0x31c   : > { %v1159_v37 = vpop.xlane.xlu0 %1158 }
 0x31d   : > { %v1189_v38 = vsub.f32 %v1083_v6, %v1159_v37 }
 0x31f   : > { %v1206_v39 = vmul.f32 1.442695, %v1189_v38 }
 0x320   : > { %v1163_v40 = vpop.xlane.xlu1 %1162  ;;  %v1157_v41 = vpop.xlane.xlu0 %1156 }
 0x321   : > { %1728 = vpow2.f32 %v1206_v39  ;;  %v1191_v42 = vsub.f32 %v1093_v10, %v1163_v40  ;;  %v1188_v43 = vsub.f32 %v1078_v9, %v1157_v41 }
 0x323   : > { %v1210_v44 = vmul.f32 1.442695, %v1191_v42  ;;  %v1204_v45 = vmul.f32 1.442695, %v1188_v43 }
 0x324   : > { %v1161_v46 = vpop.xlane.xlu1 %1160 }
 0x325   : > { %1730 = vpow2.f32 %v1210_v44  ;;  %v1190_v47 = vsub.f32 %v1088_v13, %v1161_v46 }
 0x326   : > { %1732 = vpow2.f32 %v1204_v45  ;;  %v1165_v48 = vpop.xlane.xlu0 %1164 }
 0x327   : > { %v1208_v49 = vmul.f32 1.442695, %v1190_v47  ;;  %v1192_v50 = vsub.f32 %v1098_v15, %v1165_v48 }
 0x328   : > { %v1167_v51 = vpop.xlane.xlu1 %1166 }
 0x329   : > { %1734 = vpow2.f32 %v1208_v49  ;;  %v1193_v52 = vsub.f32 %v1103_v17, %v1167_v51  ;;  %v1212_v53 = vmul.f32 1.442695, %v1192_v50 }
 0x32a   : > { %v1169_v54 = vpop.xlane.xlu0 %1168 }
 0x32b   : > { %v1214_v55 = vmul.f32 1.442695, %v1193_v52  ;;  %v1194_v56 = vsub.f32 %v1108_v19, %v1169_v54 }
 0x32c   : > { %v1171_v57 = vpop.xlane.xlu1 %1170 }
 0x32d   : > { %1736 = vpow2.f32 %v1214_v55  ;;  %v1195_v58 = vsub.f32 %v1113_v21, %v1171_v57  ;;  %v1216_v60 = vmul.f32 1.442695, %v1194_v56 }
 0x32e   : > { %v2252_v59 = vpop.eup %1728  ;;  %1738 = vpow2.f32 %v1212_v53  ;;  %v1173_v61 = vpop.xlane.xlu0 %1172 }
 0x32f   : > { %v1218_v62 = vmul.f32 1.442695, %v1195_v58  ;;  %v1196_v63 = vsub.f32 %v1118_v23, %v1173_v61  ;;  %1238 = vadd.xlane.f32.xlu1 %v2252_v59 }
 0x330   : > { %v1175_v0 = vpop.xlane.xlu1 %1174 }
 0x331   : > { %1740 = vpow2.f32 %v1218_v62  ;;  %v1197_v1 = vsub.f32 %v1123_v25, %v1175_v0  ;;  %v1220_v3 = vmul.f32 1.442695, %v1196_v63 }
 0x332   : > { %v2255_v2 = vpop.eup %1730  ;;  %1742 = vpow2.f32 %v1216_v60  ;;  %v1177_v4 = vpop.xlane.xlu0 %1176 }
 0x333   : > { %v2257_v5 = vpop.eup %1732  ;;  %v1222_v6 = vmul.f32 1.442695, %v1197_v1  ;;  %v1198_v7 = vsub.f32 %v2234_v27, %v1177_v4  ;;  %1242 = vadd.xlane.f32.xlu1 %v2255_v2 }
 0x334   : > { %1236 = vadd.xlane.f32.xlu0 %v2257_v5  ;;  %v1179_v8 = vpop.xlane.xlu1 %1178 }
 0x335   : > { %1744 = vpow2.f32 %v1222_v6  ;;  %v1199_v9 = vsub.f32 %v2236_v29, %v1179_v8  ;;  %v1224_v11 = vmul.f32 1.442695, %v1198_v7 }
 0x336   : > { %v2263_v10 = vpop.eup %1734  ;;  %1746 = vpow2.f32 %v1220_v3  ;;  %v1181_v12 = vpop.xlane.xlu0 %1180 }
 0x337   : > { %v1226_v13 = vmul.f32 1.442695, %v1199_v9  ;;  %v1200_v14 = vsub.f32 %v2239_v31, %v1181_v12 }
 0x338   : > { %1240 = vadd.xlane.f32.xlu0 %v2263_v10  ;;  %v1183_v15 = vpop.xlane.xlu1 %1182 }
 0x339   : > { %1748 = vpow2.f32 %v1226_v13  ;;  %v1201_v16 = vsub.f32 %v2242_v33, %v1183_v15  ;;  %v1228_v18 = vmul.f32 1.442695, %v1200_v14 }
 0x33a   : > { %v2268_v17 = vpop.eup %1736  ;;  %1750 = vpow2.f32 %v1224_v11  ;;  %v1185_v19 = vpop.xlane.xlu0 %1184 }
 0x33b   : > { %v2270_v20 = vpop.eup %1738  ;;  %v1230_v21 = vmul.f32 1.442695, %v1201_v16  ;;  %v1202_v22 = vsub.f32 %v2245_v35, %v1185_v19  ;;  %1246 = vadd.xlane.f32.xlu1 %v2268_v17 }
 0x33c   : > { %1244 = vadd.xlane.f32.xlu0 %v2270_v20  ;;  %v1187_v23 = vpop.xlane.xlu1 %1186 }
 0x33d   : > { %1752 = vpow2.f32 %v1230_v21  ;;  %v1203_v24 = vsub.f32 %v2248_v36, %v1187_v23  ;;  %v1232_v26 = vmul.f32 1.442695, %v1202_v22 }
 0x33e   : > { %v2276_v25 = vpop.eup %1740  ;;  %1754 = vpow2.f32 %v1228_v18 }
 0x33f   : > { %v2278_v27 = vpop.eup %1742  ;;  %v1234_v28 = vmul.f32 1.442695, %v1203_v24  ;;  %1250 = vadd.xlane.f32.xlu1 %v2276_v25 }
 0x340   : > { %1248 = vadd.xlane.f32.xlu0 %v2278_v27 }
 0x341   : > { %1756 = vpow2.f32 %v1234_v28 }
 0x342   : > { %v2282_v29 = vpop.eup %1744  ;;  %1758 = vpow2.f32 %v1232_v26 }
 0x343   : > { %v2284_v30 = vpop.eup %1746  ;;  %1254 = vadd.xlane.f32.xlu1 %v2282_v29 }
 0x344   : > { %1252 = vadd.xlane.f32.xlu0 %v2284_v30 }
 0x346   : > { %v2288_v31 = vpop.eup %1748 }
 0x347   : > { %v2290_v32 = vpop.eup %1750  ;;  %1258 = vadd.xlane.f32.xlu1 %v2288_v31 }
 0x348   : > { %1256 = vadd.xlane.f32.xlu0 %v2290_v32 }
 0x34a   : > { %v2294_v33 = vpop.eup %1752 }
 0x34b   : > { %v2296_v34 = vpop.eup %1754  ;;  %1262 = vadd.xlane.f32.xlu1 %v2294_v33 }
 0x34c   : > { %1260 = vadd.xlane.f32.xlu0 %v2296_v34 }
 0x34e   : > { %v2300_v35 = vpop.eup %1756 }
 0x34f   : > { %v2302_v36 = vpop.eup %1758  ;;  %1266 = vadd.xlane.f32.xlu1 %v2300_v35 }
 0x350   : > { %1264 = vadd.xlane.f32.xlu0 %v2302_v36 }
 0x3b8   : > { %v1239_v37 = vpop.xlane.xlu1 %1238 }
 0x3b9   : > { %1760 = vrcp.f32 %v1239_v37 }
 0x3bc   : > { %v1243_v38 = vpop.xlane.xlu1 %1242 }
 0x3bd   : > { %1762 = vrcp.f32 %v1243_v38  ;;  %v1237_v39 = vpop.xlane.xlu0 %1236 }
 0x3be   : > { %1764 = vrcp.f32 %v1237_v39 }
 0x3c1   : > { %v1241_v40 = vpop.xlane.xlu0 %1240 }
 0x3c2   : > { %1766 = vrcp.f32 %v1241_v40 }
 0x3c4   : > { %v1247_v41 = vpop.xlane.xlu1 %1246 }
 0x3c5   : > { %1768 = vrcp.f32 %v1247_v41  ;;  %v1245_v42 = vpop.xlane.xlu0 %1244 }
 0x3c6   : > { %v1761_v43 = vpop.eup %1760  ;;  %1770 = vrcp.f32 %v1245_v42 }
 0x3c7   : > { %v1285_v44 = vmul.f32 %v1761_v43, %v2252_v59 }
 0x3c8   : > { %v1251_v45 = vpop.xlane.xlu1 %1250 }
 0x3c9   : > { %1301 = vst [vmem:[%s2308_s19 + $0x8] sm:$0xff] %v1285_v44  ;;  %1772 = vrcp.f32 %v1251_v45  ;;  %v1249_v46 = vpop.xlane.xlu0 %1248 }
 0x3ca   : > { %v1763_v47 = vpop.eup %1762  ;;  %1774 = vrcp.f32 %v1249_v46 }
 0x3cb   : > { %v1765_v48 = vpop.eup %1764  ;;  %v1287_v49 = vmul.f32 %v1763_v47, %v2255_v2 }
 0x3cc   : > { %v1284_v50 = vmul.f32 %v1765_v48, %v2257_v5  ;;  %v1255_v51 = vpop.xlane.xlu1 %1254 }
 0x3cd   : > { %1303 = vst [vmem:[%s2308_s19 + $0x18] sm:$0xff] %v1287_v49  ;;  %1776 = vrcp.f32 %v1255_v51  ;;  %v1253_v52 = vpop.xlane.xlu0 %1252 }
 0x3ce   : > { %1300 = vst [vmem:[%s2308_s19] sm:$0xff] %v1284_v50  ;;  %1778 = vrcp.f32 %v1253_v52 }
 0x3cf   : > { %v1767_v53 = vpop.eup %1766 }
 0x3d0   : > { %v1286_v54 = vmul.f32 %v1767_v53, %v2263_v10  ;;  %v1259_v55 = vpop.xlane.xlu1 %1258 }
 0x3d1   : > { %1780 = vrcp.f32 %v1259_v55  ;;  %v1257_v56 = vpop.xlane.xlu0 %1256 }
 0x3d2   : > { %v1769_v57 = vpop.eup %1768  ;;  %1302 = vst [vmem:[%s2308_s19 + $0x10] sm:$0xff] %v1286_v54  ;;  %1782 = vrcp.f32 %v1257_v56 }
 0x3d3   : > { %v1771_v58 = vpop.eup %1770  ;;  %v1289_v59 = vmul.f32 %v1769_v57, %v2268_v17 }
 0x3d4   : > { %v1288_v60 = vmul.f32 %v1771_v58, %v2270_v20  ;;  %v1263_v61 = vpop.xlane.xlu1 %1262 }
 0x3d5   : > { %1305 = vst [vmem:[%s2308_s19 + $0x28] sm:$0xff] %v1289_v59  ;;  %1784 = vrcp.f32 %v1263_v61  ;;  %v1261_v62 = vpop.xlane.xlu0 %1260 }
 0x3d6   : > { %v1773_v63 = vpop.eup %1772  ;;  %1304 = vst [vmem:[%s2308_s19 + $0x20] sm:$0xff] %v1288_v60  ;;  %1786 = vrcp.f32 %v1261_v62 }
 0x3d7   : > { %v1775_v0 = vpop.eup %1774  ;;  %v1291_v1 = vmul.f32 %v1773_v63, %v2276_v25 }
 0x3d8   : > { %v1290_v2 = vmul.f32 %v1775_v0, %v2278_v27  ;;  %v1267_v3 = vpop.xlane.xlu1 %1266 }
 0x3d9   : > { %1307 = vst [vmem:[%s2308_s19 + $0x38] sm:$0xff] %v1291_v1  ;;  %1788 = vrcp.f32 %v1267_v3  ;;  %v1265_v4 = vpop.xlane.xlu0 %1264 }
 0x3da   : > { %v1777_v5 = vpop.eup %1776  ;;  %1306 = vst [vmem:[%s2308_s19 + $0x30] sm:$0xff] %v1290_v2  ;;  %1790 = vrcp.f32 %v1265_v4 }
 0x3db   : > { %v1779_v6 = vpop.eup %1778  ;;  %v1293_v7 = vmul.f32 %v1777_v5, %v2282_v29 }
 0x3dc   : > { %v1292_v8 = vmul.f32 %v1779_v6, %v2284_v30 }
 0x3dd   : > { %1309 = vst [vmem:[%s2308_s19 + $0x48] sm:$0xff] %v1293_v7 }
 0x3de   : > { %v1781_v9 = vpop.eup %1780  ;;  %1308 = vst [vmem:[%s2308_s19 + $0x40] sm:$0xff] %v1292_v8 }
 0x3df   : > { %v1783_v10 = vpop.eup %1782  ;;  %v1295_v11 = vmul.f32 %v1781_v9, %v2288_v31 }
 0x3e0   : > { %v1294_v12 = vmul.f32 %v1783_v10, %v2290_v32 }
 0x3e1   : > { %1311 = vst [vmem:[%s2308_s19 + $0x58] sm:$0xff] %v1295_v11 }
 0x3e2   : > { %v1785_v13 = vpop.eup %1784  ;;  %1310 = vst [vmem:[%s2308_s19 + $0x50] sm:$0xff] %v1294_v12 }
 0x3e3   : > { %v1787_v14 = vpop.eup %1786  ;;  %v1297_v15 = vmul.f32 %v1785_v13, %v2294_v33 }
 0x3e4   : > { %v1296_v16 = vmul.f32 %v1787_v14, %v2296_v34 }
 0x3e5   : > { %1313 = vst [vmem:[%s2308_s19 + $0x68] sm:$0xff] %v1297_v15 }
 0x3e6   : > { %v1789_v17 = vpop.eup %1788  ;;  %1312 = vst [vmem:[%s2308_s19 + $0x60] sm:$0xff] %v1296_v16 }
 0x3e7   : > { %v1791_v18 = vpop.eup %1790  ;;  %v1299_v19 = vmul.f32 %v1789_v17, %v2300_v35 }
 0x3e8   : > { %v1298_v20 = vmul.f32 %v1791_v18, %v2302_v36 }
 0x3e9   : > { %1315 = vst [vmem:[%s2308_s19 + $0x78] sm:$0xff] %v1299_v19 }
 0x3ea   : > { %1314 = vst [vmem:[%s2308_s19 + $0x70] sm:$0xff] %v1298_v20 }
 0x3eb   : > { %1805 = shalt.err (!%p1802_p5)
}
 0x3ec   : > { %s1806_s16 = scalar_lea.hbm %s2344_s9, 2048  ;;  %s1810_s19 = scalar_lea.hbm %s2399_s7, 4096 }
 0x3ed   : > { %p1807_p7 = scmp.ne.s32.totalorder %s2344_s9, %s1806_s16  ;;  %p1811_p12 = scmp.lt.s32.totalorder %s2344_s9, %s2399_s7 }
 0x3ee   : > { %p1812_p13 = scmp.lt.s32.totalorder %s1810_s19, %s1806_s16 }
 0x3ef   : > { %p1808_p10 = pnand %p1807_p7, %p1935_p6 }
 0x3f0   : > { %p1813_p0 = por %p1812_p13, %p1811_p12 }
 0x3f1   : > { %p1809_p11 = pneg %p1808_p10 }
 0x3f3   : > { %p1814_p1 = pnand %p1813_p0, %p1809_p11 }
 0x3f5   : > { %1817 = shalt.err (!%p1814_p1)
}
 0x3f6   : > { %s1855_s8 = smov 128   ;;  %s1856_s13 = smov 8  }
 0x3f7   : > { %1687 = dma.vmem_to_hbm [thread:$0]  (%p1935_p6), %s2346_s22, 2048, %s2344_s9, %s1317_s28, %s1855_s8, %s1855_s8, %s1856_s13  }
 0x3f8 PF: > { %s1345_s14 = sand.u32 1, %s1840_s24   ;;  %p1690_p2 = pnand %p1400_p9, %p1939_p8 }
 0x3f9   : > { %s1346_s15 = scalar_lea.sflag [#allocation4], %s1345_s14 }
 0x3fa   : > { %p1691_p3 = pneg %p1690_p2 }
 0x3fc   : > { %1835 = dma.done.wait (%p1691_p3), %s1346_s15, 2048  }
 0x3fd   : > { %1837 = vsyncadd (%p1691_p3), %s1346_s15, 4294965248  ;;  %p17_p4 = scmp.ge.s32.totalorder %s1920_s30, 4   ;;  %s2402_s24 = smov %s1844_s25 }
 0x3fe   : > { %s2403_s25 = smov %s1848_s26  ;;  %s2404_s26 = smov %s1933_s10 }
 0x3ff   : > { %s2405_s27 = smov %s1920_s30  ;;  %19 = sbr.rel (!%p17_p4) target bundleno = 3 (0x3), region = 128 }
 0x404   :  { %1351 = vsyncpa [#allocation4], 1 }
 0x405   :  { %1353 = vsyncpa [#allocation4 + $0x1], 1 }

</bundles_post_ra>
